<compile_context>
chip_gen: v6e
topology: v6e:2x2x1
jax: 0.10.0
libtpu: 0.0.40
codegen_flags: <defaults>
</compile_context>

<pallas_src>
import functools

import jax
import jax.numpy as jnp
import numpy as np
from jax.experimental import pallas as pl
from jax.experimental.pallas import tpu as pltpu


# --------------------------------------------------------------------------- #
# Pallas kernel: fused 1x1-conv gates + LSTM cell update (channels-first)
# --------------------------------------------------------------------------- #
def _conv_lstm_cell_kernel(x_ref, h_ref, c_ref, wx_ref, wh_ref, b_ref,
                           h_out_ref, c_out_ref, *, hidden_size):
    # x_ref : (1, Cin, T)   input pixels for this (batch, spatial-tile) block
    # h_ref : (1, Ch,  T)   prev_hidden
    # c_ref : (1, Ch,  T)   prev_cell
    # wx_ref: (4*Ch, Cin)   gate weights acting on the input channels
    # wh_ref: (4*Ch, Ch)    gate weights acting on the hidden channels
    # b_ref : (4*Ch, 1)     gate bias (broadcast over the lane/spatial dim)
    ch = hidden_size

    x = x_ref[0, :, :]
    h = h_ref[0, :, :]
    c_prev = c_ref[0, :, :].astype(jnp.float32)

    # Two MXU dots (same total K as one dot over the concat, no concat needed).
    gates = (jnp.dot(wx_ref[...], x, preferred_element_type=jnp.float32)
             + jnp.dot(wh_ref[...], h, preferred_element_type=jnp.float32)
             + b_ref[...])                                   # (4*Ch, T) f32

    # Single-EUP-push sigmoid: sigmoid(v) = 0.5 * tanh(0.5 * v) + 0.5
    def _sigmoid(v):
        return 0.5 * jnp.tanh(0.5 * v) + 0.5

    # Sublane-aligned gate slices (Ch is a multiple of 8 in practice; Ch=32).
    in_gate = _sigmoid(gates[0 * ch:1 * ch, :])
    remember_gate = _sigmoid(gates[1 * ch:2 * ch, :])
    out_gate = _sigmoid(gates[2 * ch:3 * ch, :])
    cell_gate = jnp.tanh(gates[3 * ch:4 * ch, :])

    cell = remember_gate * c_prev + in_gate * cell_gate
    hidden = out_gate * jnp.tanh(cell)

    h_out_ref[0, :, :] = hidden.astype(h_out_ref.dtype)
    c_out_ref[0, :, :] = cell.astype(c_out_ref.dtype)


def _round_up(x, m):
    return ((x + m - 1) // m) * m


def _choose_tile_n(hw, max_tile=2048):
    """Pick a lane tile (multiple of 128). Prefer one that divides hw exactly."""
    cap = min(max_tile, _round_up(hw, 128))
    t = cap
    while t >= 128:
        if hw % t == 0:
            return t
        t -= 128
    return cap


def _conv_lstm_cell_pallas(x3, h3, c3, w_x, w_h, b2, hidden_size,
                           max_tile_n=2048):
    """x3: (B, Cin, HW), h3/c3: (B, Ch, HW), w_x: (4Ch, Cin), w_h: (4Ch, Ch),
    b2: (4Ch, 1)."""
    bsz, cin, hw = x3.shape
    ch = hidden_size
    four_ch = 4 * ch

    tile_n = _choose_tile_n(hw, max_tile_n)
    hw_pad = _round_up(hw, tile_n)
    if hw_pad != hw:
        pad = ((0, 0), (0, 0), (0, hw_pad - hw))
        x3 = jnp.pad(x3, pad)
        h3 = jnp.pad(h3, pad)
        c3 = jnp.pad(c3, pad)

    n_tiles = hw_pad // tile_n
    grid = (bsz, n_tiles)
    kernel = functools.partial(_conv_lstm_cell_kernel, hidden_size=ch)

    h_new, c_new = pl.pallas_call(
        kernel,
        out_shape=(
            jax.ShapeDtypeStruct((bsz, ch, hw_pad), x3.dtype),
            jax.ShapeDtypeStruct((bsz, ch, hw_pad), x3.dtype),
        ),
        grid_spec=pltpu.PrefetchScalarGridSpec(
            num_scalar_prefetch=0,
            grid=grid,
            in_specs=[
                pl.BlockSpec((1, cin, tile_n), lambda b, j: (b, 0, j)),
                pl.BlockSpec((1, ch, tile_n), lambda b, j: (b, 0, j)),
                pl.BlockSpec((1, ch, tile_n), lambda b, j: (b, 0, j)),
                pl.BlockSpec((four_ch, cin), lambda b, j: (0, 0)),
                pl.BlockSpec((four_ch, ch), lambda b, j: (0, 0)),
                pl.BlockSpec((four_ch, 1), lambda b, j: (0, 0)),
            ],
            out_specs=[
                pl.BlockSpec((1, ch, tile_n), lambda b, j: (b, 0, j)),
                pl.BlockSpec((1, ch, tile_n), lambda b, j: (b, 0, j)),
            ],
        ),
        compiler_params=pltpu.CompilerParams(
            dimension_semantics=("parallel", "parallel"),
            vmem_limit_bytes=32 * 1024 * 1024),
    )(x3, h3, c3, w_x, w_h, b2)

    if hw_pad != hw:
        h_new = h_new[:, :, :hw]
        c_new = c_new[:, :, :hw]
    return h_new, c_new


# --------------------------------------------------------------------------- #
# Module-level wrapper (NCHW interface, matches PyTorch semantics)
# --------------------------------------------------------------------------- #
class ConvLSTMCellPallas:
    def __init__(self, input_size, hidden_size, kernel_size=1, bias=True,
                 key=jax.random.PRNGKey(0)):
        assert kernel_size == 1, "only kernel_size=1 (module default) supported"
        self.input_size = input_size
        self.hidden_size = hidden_size
        self.kernel_size = kernel_size
        self.bias = bias

        in_ch = input_size + hidden_size
        out_ch = 4 * hidden_size
        kw, kb = jax.random.split(key)
        # Deterministic init mimicking nn.Conv2d default (uniform +- 1/sqrt(fan_in)).
        bound = 1.0 / np.sqrt(in_ch * kernel_size * kernel_size)
        w4 = jax.random.uniform(kw, (out_ch, in_ch, 1, 1), jnp.float32,
                                -bound, bound)
        w2 = w4[:, :, 0, 0]                                   # (4Ch, Cin+Ch)
        # Split the 1x1-conv weight so the kernel can consume x and h without
        # a wrapper-side channel concat.
        self.w_x = w2[:, :input_size]                         # (4Ch, Cin)
        self.w_h = w2[:, input_size:]                         # (4Ch, Ch)
        self.bias_vec = (jax.random.uniform(kb, (out_ch,), jnp.float32,
                                            -bound, bound)
                         if bias else jnp.zeros((out_ch,), jnp.float32))

    def __call__(self, input_, prev_state=None):
        # input_: (B, Cin, H, W)   NCHW, matching the PyTorch module.
        b, _, hh, ww = input_.shape
        hw = hh * ww
        state_shape = (b, self.hidden_size, hh, ww)

        # Faithful to the PyTorch check: re-init when None or shape mismatch
        # against input_ (note: always mismatches when Cin != Ch, as upstream).
        if prev_state is None or prev_state[0].shape != input_.shape:
            prev_state = (jnp.zeros(state_shape, input_.dtype),
                          jnp.zeros(state_shape, input_.dtype))
        prev_hidden, prev_cell = prev_state

        # Channels-first, spatial flattened onto the lane dim (free reshapes,
        # no transposes, no concat).
        x3 = input_.reshape(b, self.input_size, hw)
        h3 = prev_hidden.reshape(b, self.hidden_size, hw)
        c3 = prev_cell.reshape(b, self.hidden_size, hw)
        b2 = self.bias_vec.reshape(-1, 1)

        h_new, c_new = _conv_lstm_cell_pallas(x3, h3, c3, self.w_x, self.w_h,
                                              b2, self.hidden_size)

        hidden = h_new.reshape(state_shape)
        cell = c_new.reshape(state_shape)
        return hidden, cell


# --------------------------------------------------------------------------- #
# Pure-JAX reference for a correctness check.
# --------------------------------------------------------------------------- #
def _reference(input_, w_x, w_h, bias_vec, hidden_size, prev_state=None):
    b, _, hh, ww = input_.shape
    if prev_state is None:
        prev_state = (jnp.zeros((b, hidden_size, hh, ww), input_.dtype),) * 2
    prev_hidden, prev_cell = prev_state
    gates = (jnp.einsum('oc,bchw->bohw', w_x, input_)
             + jnp.einsum('oc,bchw->bohw', w_h, prev_hidden)
             + bias_vec[None, :, None, None])
    i, r, o, g = jnp.split(gates, 4, axis=1)
    i, r, o, g = (jax.nn.sigmoid(i), jax.nn.sigmoid(r), jax.nn.sigmoid(o),
                  jnp.tanh(g))
    cell = r * prev_cell + i * g
    hidden = o * jnp.tanh(cell)
    return hidden, cell


if __name__ == "__main__":
    key = jax.random.PRNGKey(0)
    k_x, k_mod = jax.random.split(key)

    batch, input_size, hidden_size, spatial = 2, 4, 32, 16
    x = jax.random.normal(k_x, (batch, input_size, spatial, spatial),
                          jnp.float32)

    cell_mod = ConvLSTMCellPallas(input_size, hidden_size, kernel_size=1,
                                  bias=True, key=k_mod)

    hidden, cell = cell_mod(x, prev_state=None)
    hidden = jax.block_until_ready(hidden)
    cell = jax.block_until_ready(cell)

    h_ref, c_ref = _reference(x, cell_mod.w_x, cell_mod.w_h,
                              cell_mod.bias_vec, hidden_size)
    np.testing.assert_allclose(np.asarray(hidden), np.asarray(h_ref),
                               rtol=2e-5, atol=2e-5)
    np.testing.assert_allclose(np.asarray(cell), np.asarray(c_ref),
                               rtol=2e-5, atol=2e-5)

    print("KERNEL_OK")
</pallas_src>

<mosaic_0001>
module attributes {stable_mosaic.version = 11 : i64} {
  func.func @_conv_lstm_cell_kernel(%arg0: i32, %arg1: i32, %arg2: memref<1x4x256xf32, #tpu.memory_space<vmem>>, %arg3: memref<1x32x256xf32, #tpu.memory_space<vmem>>, %arg4: memref<1x32x256xf32, #tpu.memory_space<vmem>>, %arg5: memref<128x4xf32, #tpu.memory_space<vmem>>, %arg6: memref<128x32xf32, #tpu.memory_space<vmem>>, %arg7: memref<128x1xf32, #tpu.memory_space<vmem>>, %arg8: memref<1x32x256xf32, #tpu.memory_space<vmem>>, %arg9: memref<1x32x256xf32, #tpu.memory_space<vmem>>) attributes {dimension_semantics = [#tpu.dimension_semantics<parallel>, #tpu.dimension_semantics<parallel>], iteration_bounds = array<i64: 2, 1>, scalar_prefetch = 0 : i64, scratch_operands = 0 : i64, tpu.core_type = #tpu.core_type<tc>, window_params = [{transform_indices = @transform_0, window_bounds = array<i64: 1, 4, 256>}, {transform_indices = @transform_1, window_bounds = array<i64: 1, 32, 256>}, {transform_indices = @transform_2, window_bounds = array<i64: 1, 32, 256>}, {pipeline_mode = #tpu.pipeline_mode<synchronous>, transform_indices = @transform_3, window_bounds = array<i64: 128, 4>}, {pipeline_mode = #tpu.pipeline_mode<synchronous>, transform_indices = @transform_4, window_bounds = array<i64: 128, 32>}, {pipeline_mode = #tpu.pipeline_mode<synchronous>, transform_indices = @transform_5, window_bounds = array<i64: 128, 1>}, {transform_indices = @transform_6, window_bounds = array<i64: 1, 32, 256>}, {transform_indices = @transform_7, window_bounds = array<i64: 1, 32, 256>}]} {
    %c0 = arith.constant 0 : index
    %c0_0 = arith.constant 0 : index
    %c0_1 = arith.constant 0 : index
    %0 = vector.load %arg2[%c0, %c0_0, %c0_1] : memref<1x4x256xf32, #tpu.memory_space<vmem>>, vector<1x4x256xf32>
    %1 = vector.shape_cast %0 : vector<1x4x256xf32> to vector<4x256xf32>
    %c0_2 = arith.constant 0 : index
    %c0_3 = arith.constant 0 : index
    %c0_4 = arith.constant 0 : index
    %2 = vector.load %arg3[%c0_2, %c0_3, %c0_4] : memref<1x32x256xf32, #tpu.memory_space<vmem>>, vector<1x32x256xf32>
    %3 = vector.shape_cast %2 : vector<1x32x256xf32> to vector<32x256xf32>
    %c0_5 = arith.constant 0 : index
    %c0_6 = arith.constant 0 : index
    %c0_7 = arith.constant 0 : index
    %4 = vector.load %arg4[%c0_5, %c0_6, %c0_7] : memref<1x32x256xf32, #tpu.memory_space<vmem>>, vector<1x32x256xf32>
    %5 = vector.shape_cast %4 : vector<1x32x256xf32> to vector<32x256xf32>
    %c0_8 = arith.constant 0 : index
    %c0_9 = arith.constant 0 : index
    %6 = vector.load %arg5[%c0_8, %c0_9] : memref<128x4xf32, #tpu.memory_space<vmem>>, vector<128x4xf32>
    %cst = arith.constant dense<0.000000e+00> : vector<128x256xf32>
    %7 = tpu.matmul %6, %1, %cst {dimension_numbers = #tpu.dot_dimension_numbers<[1], [0], [0], [1], [0, 0, 1, 1], [], []>} : vector<128x4xf32>, vector<4x256xf32>, vector<128x256xf32> -> vector<128x256xf32>
    %c0_10 = arith.constant 0 : index
    %c0_11 = arith.constant 0 : index
    %8 = vector.load %arg6[%c0_10, %c0_11] : memref<128x32xf32, #tpu.memory_space<vmem>>, vector<128x32xf32>
    %cst_12 = arith.constant dense<0.000000e+00> : vector<128x256xf32>
    %9 = tpu.matmul %8, %3, %cst_12 {dimension_numbers = #tpu.dot_dimension_numbers<[1], [0], [0], [1], [0, 0, 1, 1], [], []>} : vector<128x32xf32>, vector<32x256xf32>, vector<128x256xf32> -> vector<128x256xf32>
    %10 = arith.addf %7, %9 : vector<128x256xf32>
    %c0_13 = arith.constant 0 : index
    %c0_14 = arith.constant 0 : index
    %11 = vector.load %arg7[%c0_13, %c0_14] : memref<128x1xf32, #tpu.memory_space<vmem>>, vector<128x1xf32>
    %12 = vector.broadcast %11 : vector<128x1xf32> to vector<128x256xf32>
    %13 = arith.addf %10, %12 : vector<128x256xf32>
    %14 = vector.extract_strided_slice %13 {offsets = [0, 0], sizes = [32, 256], strides = [1, 1]} : vector<128x256xf32> to vector<32x256xf32>
    %cst_15 = arith.constant 5.000000e-01 : f32
    %15 = vector.broadcast %cst_15 : f32 to vector<32x256xf32>
    %16 = arith.mulf %15, %14 : vector<32x256xf32>
    %17 = math.tanh %16 : vector<32x256xf32>
    %cst_16 = arith.constant 5.000000e-01 : f32
    %18 = vector.broadcast %cst_16 : f32 to vector<32x256xf32>
    %19 = arith.mulf %18, %17 : vector<32x256xf32>
    %cst_17 = arith.constant 5.000000e-01 : f32
    %20 = vector.broadcast %cst_17 : f32 to vector<32x256xf32>
    %21 = arith.addf %19, %20 : vector<32x256xf32>
    %22 = vector.extract_strided_slice %13 {offsets = [32, 0], sizes = [32, 256], strides = [1, 1]} : vector<128x256xf32> to vector<32x256xf32>
    %cst_18 = arith.constant 5.000000e-01 : f32
    %23 = vector.broadcast %cst_18 : f32 to vector<32x256xf32>
    %24 = arith.mulf %23, %22 : vector<32x256xf32>
    %25 = math.tanh %24 : vector<32x256xf32>
    %cst_19 = arith.constant 5.000000e-01 : f32
    %26 = vector.broadcast %cst_19 : f32 to vector<32x256xf32>
    %27 = arith.mulf %26, %25 : vector<32x256xf32>
    %cst_20 = arith.constant 5.000000e-01 : f32
    %28 = vector.broadcast %cst_20 : f32 to vector<32x256xf32>
    %29 = arith.addf %27, %28 : vector<32x256xf32>
    %30 = vector.extract_strided_slice %13 {offsets = [64, 0], sizes = [32, 256], strides = [1, 1]} : vector<128x256xf32> to vector<32x256xf32>
    %cst_21 = arith.constant 5.000000e-01 : f32
    %31 = vector.broadcast %cst_21 : f32 to vector<32x256xf32>
    %32 = arith.mulf %31, %30 : vector<32x256xf32>
    %33 = math.tanh %32 : vector<32x256xf32>
    %cst_22 = arith.constant 5.000000e-01 : f32
    %34 = vector.broadcast %cst_22 : f32 to vector<32x256xf32>
    %35 = arith.mulf %34, %33 : vector<32x256xf32>
    %cst_23 = arith.constant 5.000000e-01 : f32
    %36 = vector.broadcast %cst_23 : f32 to vector<32x256xf32>
    %37 = arith.addf %35, %36 : vector<32x256xf32>
    %38 = vector.extract_strided_slice %13 {offsets = [96, 0], sizes = [32, 256], strides = [1, 1]} : vector<128x256xf32> to vector<32x256xf32>
    %39 = math.tanh %38 : vector<32x256xf32>
    %40 = arith.mulf %29, %5 : vector<32x256xf32>
    %41 = arith.mulf %21, %39 : vector<32x256xf32>
    %42 = arith.addf %40, %41 : vector<32x256xf32>
    %43 = math.tanh %42 : vector<32x256xf32>
    %44 = arith.mulf %37, %43 : vector<32x256xf32>
    %c0_24 = arith.constant 0 : index
    %c0_25 = arith.constant 0 : index
    %c0_26 = arith.constant 0 : index
    %45 = vector.load %arg8[%c0_24, %c0_25, %c0_26] : memref<1x32x256xf32, #tpu.memory_space<vmem>>, vector<1x32x256xf32>
    %46 = vector.shape_cast %45 : vector<1x32x256xf32> to vector<32x256xf32>
    %47 = vector.shape_cast %44 : vector<32x256xf32> to vector<1x32x256xf32>
    tpu.vector_store %arg8[%c0_24, %c0_25, %c0_26], %47 {strides = array<i32>} : memref<1x32x256xf32, #tpu.memory_space<vmem>>, vector<1x32x256xf32>,
    %c0_27 = arith.constant 0 : index
    %c0_28 = arith.constant 0 : index
    %c0_29 = arith.constant 0 : index
    %48 = vector.load %arg9[%c0_27, %c0_28, %c0_29] : memref<1x32x256xf32, #tpu.memory_space<vmem>>, vector<1x32x256xf32>
    %49 = vector.shape_cast %48 : vector<1x32x256xf32> to vector<32x256xf32>
    %50 = vector.shape_cast %42 : vector<32x256xf32> to vector<1x32x256xf32>
    tpu.vector_store %arg9[%c0_27, %c0_28, %c0_29], %50 {strides = array<i32>} : memref<1x32x256xf32, #tpu.memory_space<vmem>>, vector<1x32x256xf32>,
    return
  }
  func.func @transform_0(%arg0: i32, %arg1: i32) -> (i32, i32, i32) {
    %c0_i32 = arith.constant 0 : i32
    %c0_i32_0 = arith.constant 0 : i32
    return %arg0, %c0_i32, %arg1 : i32, i32, i32
  }
  func.func @transform_1(%arg0: i32, %arg1: i32) -> (i32, i32, i32) {
    %c0_i32 = arith.constant 0 : i32
    %c0_i32_0 = arith.constant 0 : i32
    return %arg0, %c0_i32, %arg1 : i32, i32, i32
  }
  func.func @transform_2(%arg0: i32, %arg1: i32) -> (i32, i32, i32) {
    %c0_i32 = arith.constant 0 : i32
    %c0_i32_0 = arith.constant 0 : i32
    return %arg0, %c0_i32, %arg1 : i32, i32, i32
  }
  func.func @transform_3(%arg0: i32, %arg1: i32) -> (i32, i32) {
    %c0_i32 = arith.constant 0 : i32
    %c0_i32_0 = arith.constant 0 : i32
    %c0_i32_1 = arith.constant 0 : i32
    return %c0_i32, %c0_i32_0 : i32, i32
  }
  func.func @transform_4(%arg0: i32, %arg1: i32) -> (i32, i32) {
    %c0_i32 = arith.constant 0 : i32
    %c0_i32_0 = arith.constant 0 : i32
    %c0_i32_1 = arith.constant 0 : i32
    return %c0_i32, %c0_i32_0 : i32, i32
  }
  func.func @transform_5(%arg0: i32, %arg1: i32) -> (i32, i32) {
    %c0_i32 = arith.constant 0 : i32
    %c0_i32_0 = arith.constant 0 : i32
    %c0_i32_1 = arith.constant 0 : i32
    return %c0_i32, %c0_i32_0 : i32, i32
  }
  func.func @transform_6(%arg0: i32, %arg1: i32) -> (i32, i32, i32) {
    %c0_i32 = arith.constant 0 : i32
    %c0_i32_0 = arith.constant 0 : i32
    return %arg0, %c0_i32, %arg1 : i32, i32, i32
  }
  func.func @transform_7(%arg0: i32, %arg1: i32) -> (i32, i32, i32) {
    %c0_i32 = arith.constant 0 : i32
    %c0_i32_0 = arith.constant 0 : i32
    return %arg0, %c0_i32, %arg1 : i32, i32, i32
  }
}

</mosaic_0001>

<bundles_post_ra>
// kernel: tpu_custom_call.1
= control target key start
LH: loop header
LB: loop body
LE: loop exit
PB: predicated region body
PF: predicated region fallthrough
CT: control target
= control target key end

     0   :  { %13 = vsyncpa [#allocation3], 0  ;;  %s2213_s0 = inlined_call_operand.vmem [shape: f32[2,4,256], index: 0, kind: input, shape index: {}]   ;;  %s2214_s1 = inlined_call_operand.vmem [shape: f32[2,32,256], index: 1, kind: input, shape index: {}]   ;;  %s2215_s2 = inlined_call_operand.vmem [shape: f32[2,32,256], index: 2, kind: input, shape index: {}]   ;;  %s2216_s3 = inlined_call_operand.vmem [shape: f32[128,4], index: 3, kind: input, shape index: {}]   ;;  %s2217_s4 = inlined_call_operand.vmem [shape: f32[128,32], index: 4, kind: input, shape index: {}]   ;;  %s2218_s5 = inlined_call_operand.vmem [shape: f32[128,1], index: 5, kind: input, shape index: {}]   ;;  %s2219_s6 = inlined_call_operand.hbm [shape: f32[2,32,256], index: 6, kind: output, shape index: {0}]   ;;  %s2220_s7 = inlined_call_operand.hbm [shape: f32[2,32,256], index: 7, kind: output, shape index: {1}]  }
   0x1   :  { %15 = vsyncpa [#allocation3 + $0x1], 0 }
   0x2   :  { %16 = vsyncpa [#allocation5], 0 }
   0x3   :  { %18 = vsyncpa [#allocation5 + $0x1], 0  ;;  %s1708_s24 = smov 0   ;;  %s1710_s25 = smov 0  }
   0x4   :  { %s1712_s26 = smov 0   ;;  %s1714_s27 = smov 0  }
   0x5   :  { %s1716_s28 = smov 0   ;;  %s1718_s29 = smov 0  }
   0x6 LB: > { %s1347_s30 = sadd.s32 4294967295, %s1660_s29   ;;  %s1348_s8 = sadd.s32 4294967294, %s1660_s29   ;;  %s1660_s29 = sphi %s1718_s29, %s24_s29   ;;  %s1656_s28 = sphi %s1716_s28, %s2230_s28   ;;  %s1652_s27 = sphi %s1714_s27, %s2229_s27   ;;  %s1648_s26 = sphi %s1712_s26, %s2228_s26   ;;  %s1644_s25 = sphi %s1710_s25, %s2227_s25   ;;  %s1640_s24 = sphi %s1708_s24, %s2226_s24  }
   0x7   : > { %s36_s9 = sadd.s32 1, %s1656_s28  ;;  %s192_s10 = sadd.s32 1, %s1648_s26 }
   0x8   : > { %p38_p0 = scmp.ge.s32.totalorder %s36_s9, 2  ;;  %p202_p1 = scmp.ne.s32.totalorder %s1648_s26, %s1644_s25 }
   0x9   : > { %p203_p2 = scmp.eq.s32.totalorder %s1347_s30, 1  ;;  %p208_p3 = scmp.ne.s32.totalorder %s1644_s25, %s1640_s24 }
   0xa   : > { %s2232_s9 = smov (%p38_p0, %s36_s9), 0  ;;  %p209_p5 = scmp.eq.s32.totalorder %s1348_s8, 1 }
   0xb   : > { %p1748_p4 = por %p203_p2, %p202_p1  ;;  %s187_s12 = ssub.s32 %s1656_s28, %s2232_s9 }
   0xc   : > { %p1351_p6 = scmp.ge.s32.totalorder %s1660_s29, 1  ;;  %p190_p7 = scmp.eq.s32.totalorder %s187_s12, 0 }
   0xd   : > { %p1755_p8 = por %p209_p5, %p208_p3  ;;  %p303_p9 = scmp.lt.s32.totalorder %s1660_s29, 3 }
   0xe   : > { %s1761_s14 = scalar_select %p190_p7, %s1648_s26, %s192_s10  }
   0xf   : > { %p304_p10 = pnand %p1351_p6, %p303_p9 }
  0x10   : > { %p363_p11 = scmp.lt.s32.totalorder (!%p304_p10), %s1652_s27, 1  ;;  %s2221_s8 = sshll.u32 (!%p304_p10), %s1652_s27, 10 }
  0x11   : > { %307 = sbr.rel (%p304_p10) target bundleno = 356 (0x164), region = 44  ;;  %s2114_s18 = scalar_lea.hbm (!%p304_p10), %s2220_s7, %s2221_s8 }
  0x12   : > { %s1664_s22 = smov (!%p304_p10), [#allocation4]  }
  0x16   : > { %v1662_v0 = vmov 0.0   ;;  %s1767_s15 = scalar_select %p363_p11, %s1652_s27, 1  ;;  %v1663_v1 = vmov 0   ;;  %vm704_vm0 = vcmask 1043456   ;;  %v411_v10 = vld [vmem:[%s2216_s3] sm:$0xff]  ;;  %vm655_vm1 = vcmask 31744  }
  0x17   : > { %773 = vmatprep.mubr.f32.mxu1 %v1662_v0  ;;  %556 = vmatprep.mubr.f32.mxu0 %v1662_v0  ;;  %v427_v13 = vld [vmem:[%s2217_s4] sm:$0xff]  ;;  %vm443_vm2 = vcmask 261120   ;;  %v412_v14 = vld [vmem:[%s2216_s3 + $0x8] sm:$0xff]  ;;  %v872_v16 = vld [vmem:[%s2218_s5 + $0x10] sm:$0xff] }
  0x18   : > { %1471 = vset.pattern.permute.xlu0 %v1663_v1  ;;  %1472 = vset.pattern.permute.xlu1 %v1663_v1  ;;  %s1403_s16 = sshll.u32 %s1767_s15, 6  ;;  %s1402_s17 = sshll.u32 %s1767_s15, 3  ;;  %v870_v15 = vld [vmem:[%s2218_s5] sm:$0xff]  ;;  %v428_v17 = vld [vmem:[%s2217_s4 + $0x8] sm:$0xff]  ;;  %v413_v19 = vld [vmem:[%s2216_s3 + $0x10] sm:$0xff] }
  0x19   : > { %s380_s20 = scalar_lea.vmem %s2214_s1, %s1403_s16  ;;  %s370_s23 = scalar_lea.vmem %s2213_s0, %s1402_s17  ;;  %888 = vperm.xlu0 %1471, %v870_v15   ;;  %v871_v18 = vld [vmem:[%s2218_s5 + $0x8] sm:$0xff]  ;;  %898 = vperm.xlu1 %1472, %v872_v16   ;;  %v873_v20 = vld [vmem:[%s2218_s5 + $0x18] sm:$0xff]  ;;  %v429_v21 = vld [vmem:[%s2217_s4 + $0x10] sm:$0xff] }
  0x1a   : > { %v402_v2 = vld [vmem:[%s380_s20 + $0x38] sm:$0xff]  ;;  %v401_v3 = vld [vmem:[%s380_s20 + $0x30] sm:$0xff]  ;;  %v400_v4 = vld [vmem:[%s380_s20 + $0x28] sm:$0xff]  ;;  %s2073_s15 = sand.u32 1, %s1644_s25  }
  0x1b   : > { %516 = vmatprep.subr.mxu0 %v402_v2  ;;  %v399_v5 = vld [vmem:[%s380_s20 + $0x20] sm:$0xff]  ;;  %v398_v7 = vld [vmem:[%s380_s20 + $0x18] sm:$0xff]  ;;  %v397_v9 = vld [vmem:[%s380_s20 + $0x10] sm:$0xff] }
  0x1c   : > { %v394_v6 = vld [vmem:[%s370_s23] sm:$0xff]  ;;  %517 = vmatpush1.msra.mxu0 %v401_v3  ;;  %v396_v11 = vld [vmem:[%s380_s20 + $0x8] sm:$0xff]  ;;  %v414_v23 = vld [vmem:[%s2216_s3 + $0x18] sm:$0xff]  ;;  %s2065_s23 = scalar_lea.vmem %s2215_s2, %s1403_s16  ;;  %s1352_s16 = sshll.u32 %s2073_s15, 6 }
  0x1d   : > { %v654_v8 = vcombine.high %v394_v6, %v394_v6  ;;  %518 = vmatprep.subr.mxu0 %v400_v4  ;;  %v395_v12 = vld [vmem:[%s380_s20] sm:$0xff]  ;;  %893 = vperm.xlu0 %1471, %v871_v18   ;;  %v875_v24 = vld [vmem:[%s2218_s5 + $0x28] sm:$0xff]  ;;  %v430_v25 = vld [vmem:[%s2217_s4 + $0x18] sm:$0xff]  ;;  %s2090_s30 = scalar_lea.vmem [#allocation4], %s1352_s16  ;;  %s2121_s19 = scalar_lea.vmem [#allocation2], %s1352_s16 }
  0x1e   : > { %519 = vmatpush1.msra.mxu0 %v399_v5  ;;  %v874_v22 = vld [vmem:[%s2218_s5 + $0x20] sm:$0xff]  ;;  %903 = vperm.xlu1 %1472, %v873_v20   ;;  %v876_v26 = vld [vmem:[%s2218_s5 + $0x30] sm:$0xff]  ;;  %v877_v28 = vld [vmem:[%s2218_s5 + $0x38] sm:$0xff]  ;;  %s1197_s10 = sshll.u32 %s2090_s30, 4  ;;  %s2116_s10 = int_to_ptr.vmem [resolvable:$true] %s1197_s10 }
  0x1f   : > { %1376 = vmatprep.subr.msk.mxu1 %vm704_vm0, %v654_v8  ;;  %520 = vmatprep.subr.mxu0 %v398_v7  ;;  %v415_v27 = vld [vmem:[%s2216_s3 + $0x20] sm:$0xff]  ;;  %v416_v31 = vld [vmem:[%s2216_s3 + $0x28] sm:$0xff]  ;;  %v884_v34 = vld [vmem:[%s2218_s5 + $0x70] sm:$0xff]  ;;  %s1554_s20 = scalar_lea.vmem %s2116_s10, 1024 }
  0x20   : > { %1377 = vmatpush1.msk.msra.mxu1 %vm704_vm0, %v394_v6  ;;  %521 = vmatpush1.msra.mxu0 %v397_v9  ;;  %v431_v29 = vld [vmem:[%s2217_s4 + $0x20] sm:$0xff]  ;;  %v883_v32 = vld [vmem:[%s2218_s5 + $0x68] sm:$0xff]  ;;  %v417_v35 = vld [vmem:[%s2216_s3 + $0x30] sm:$0xff]  ;;  %p1555_p12 = scmp.ne.s32.totalorder %s2116_s10, %s1554_s20 }
  0x21   : > { %1378 = vmatmul.mubr.msk.f32.vlgmr.msra.gmra.mxu1 %vm655_vm1, %v411_v10  ;;  %522 = vmatprep.subr.mxu0 %v396_v11  ;;  %v882_v30 = vld [vmem:[%s2218_s5 + $0x60] sm:$0xff]  ;;  %v432_v33 = vld [vmem:[%s2217_s4 + $0x28] sm:$0xff]  ;;  %v885_v36 = vld [vmem:[%s2218_s5 + $0x78] sm:$0xff] }
  0x22   : > { %779 = vmatprep.mubr.f32.mxu1 %v1662_v0  ;;  %523 = vmatpush1.msra.mxu0 %v395_v12  ;;  %v433_v37 = vld [vmem:[%s2217_s4 + $0x30] sm:$0xff]  ;;  %v878_v38 = vld [vmem:[%s2218_s5 + $0x40] sm:$0xff]  ;;  %v418_v39 = vld [vmem:[%s2216_s3 + $0x38] sm:$0xff]  ;;  %p1556_p13 = pnand %p1555_p12, %p1748_p4 }
  0x23   : > { %1360 = vmatmul.mubr.msk.f32.vlgmr.msra.gmra.mxu0 %vm443_vm2, %v427_v13  ;;  %908 = vperm.xlu0 %1471, %v874_v22   ;;  %v879_v40 = vld [vmem:[%s2218_s5 + $0x48] sm:$0xff]  ;;  %v434_v41 = vld [vmem:[%s2217_s4 + $0x38] sm:$0xff]  ;;  %v880_v42 = vld [vmem:[%s2218_s5 + $0x50] sm:$0xff] }
  0x24   : > { %562 = vmatprep.mubr.f32.mxu0 %v1662_v0  ;;  %913 = vperm.xlu1 %1472, %v875_v24   ;;  %v419_v43 = vld [vmem:[%s2216_s3 + $0x40] sm:$0xff]  ;;  %v881_v44 = vld [vmem:[%s2218_s5 + $0x58] sm:$0xff]  ;;  %v420_v46 = vld [vmem:[%s2216_s3 + $0x48] sm:$0xff]  ;;  %p1557_p0 = pneg %p1556_p13 }
  0x25   : > { %1379 = vmatmul.mubr.msk.f32.gmra.mxu1 %vm655_vm1, %v412_v14  ;;  %v435_v45 = vld [vmem:[%s2217_s4 + $0x40] sm:$0xff]  ;;  %v436_v47 = vld [vmem:[%s2217_s4 + $0x48] sm:$0xff]  ;;  %v421_v48 = vld [vmem:[%s2216_s3 + $0x50] sm:$0xff] }
  0x26   : > { %785 = vmatprep.mubr.f32.mxu1 %v1662_v0  ;;  %v437_v49 = vld [vmem:[%s2217_s4 + $0x50] sm:$0xff]  ;;  %v422_v50 = vld [vmem:[%s2216_s3 + $0x58] sm:$0xff]  ;;  %v423_v52 = vld [vmem:[%s2216_s3 + $0x60] sm:$0xff] }
  0x27   : > { %1361 = vmatmul.mubr.msk.f32.gmra.mxu0 %vm443_vm2, %v428_v17  ;;  %918 = vperm.xlu0 %1471, %v876_v26   ;;  %v438_v51 = vld [vmem:[%s2217_s4 + $0x58] sm:$0xff]  ;;  %v439_v53 = vld [vmem:[%s2217_s4 + $0x60] sm:$0xff]  ;;  %v424_v54 = vld [vmem:[%s2216_s3 + $0x68] sm:$0xff] }
  0x28   : > { %568 = vmatprep.mubr.f32.mxu0 %v1662_v0  ;;  %923 = vperm.xlu1 %1472, %v877_v28   ;;  %v440_v55 = vld [vmem:[%s2217_s4 + $0x68] sm:$0xff]  ;;  %v425_v56 = vld [vmem:[%s2216_s3 + $0x70] sm:$0xff]  ;;  %v426_v58 = vld [vmem:[%s2216_s3 + $0x78] sm:$0xff] }
  0x29   : > { %1380 = vmatmul.mubr.msk.f32.gmra.mxu1 %vm655_vm1, %v413_v19  ;;  %v441_v57 = vld [vmem:[%s2217_s4 + $0x70] sm:$0xff]  ;;  %v442_v59 = vld [vmem:[%s2217_s4 + $0x78] sm:$0xff] }
  0x2a   : > { %791 = vmatprep.mubr.f32.mxu1 %v1662_v0 }
  0x2b   : > { %1362 = vmatmul.mubr.msk.f32.gmra.mxu0 %vm443_vm2, %v429_v21  ;;  %948 = vperm.xlu0 %1471, %v882_v30  }
  0x2c   : > { %574 = vmatprep.mubr.f32.mxu0 %v1662_v0  ;;  %953 = vperm.xlu1 %1472, %v883_v32  }
  0x2d   : > { %1381 = vmatmul.mubr.msk.f32.gmra.mxu1 %vm655_vm1, %v414_v23 }
  0x2e   : > { %797 = vmatprep.mubr.f32.mxu1 %v1662_v0 }
  0x2f   : > { %1363 = vmatmul.mubr.msk.f32.gmra.mxu0 %vm443_vm2, %v430_v25  ;;  %958 = vperm.xlu0 %1471, %v884_v34  }
  0x30   : > { %580 = vmatprep.mubr.f32.mxu0 %v1662_v0  ;;  %963 = vperm.xlu1 %1472, %v885_v36  }
  0x31   : > { %1382 = vmatmul.mubr.msk.f32.gmra.mxu1 %vm655_vm1, %v415_v27 }
  0x32   : > { %803 = vmatprep.mubr.f32.mxu1 %v1662_v0 }
  0x33   : > { %1364 = vmatmul.mubr.msk.f32.gmra.mxu0 %vm443_vm2, %v431_v29  ;;  %928 = vperm.xlu0 %1471, %v878_v38  }
  0x34   : > { %586 = vmatprep.mubr.f32.mxu0 %v1662_v0  ;;  %933 = vperm.xlu1 %1472, %v879_v40  }
  0x35   : > { %1383 = vmatmul.mubr.msk.f32.gmra.mxu1 %vm655_vm1, %v416_v31 }
  0x36   : > { %809 = vmatprep.mubr.f32.mxu1 %v1662_v0 }
  0x37   : > { %1365 = vmatmul.mubr.msk.f32.gmra.mxu0 %vm443_vm2, %v432_v33  ;;  %938 = vperm.xlu0 %1471, %v880_v42  }
  0x38   : > { %592 = vmatprep.mubr.f32.mxu0 %v1662_v0  ;;  %943 = vperm.xlu1 %1472, %v881_v44  }
  0x39   : > { %1384 = vmatmul.mubr.msk.f32.gmra.mxu1 %vm655_vm1, %v417_v35 }
  0x3a   : > { %815 = vmatprep.mubr.f32.mxu1 %v1662_v0 }
  0x3b   : > { %1366 = vmatmul.mubr.msk.f32.gmra.mxu0 %vm443_vm2, %v433_v37 }
  0x3c   : > { %598 = vmatprep.mubr.f32.mxu0 %v1662_v0 }
  0x3d   : > { %1385 = vmatmul.mubr.msk.f32.gmra.mxu1 %vm655_vm1, %v418_v39 }
  0x3e   : > { %821 = vmatprep.mubr.f32.mxu1 %v1662_v0 }
  0x3f   : > { %1367 = vmatmul.mubr.msk.f32.gmra.mxu0 %vm443_vm2, %v434_v41 }
  0x40   : > { %604 = vmatprep.mubr.f32.mxu0 %v1662_v0 }
  0x41   : > { %1386 = vmatmul.mubr.msk.f32.gmra.mxu1 %vm655_vm1, %v419_v43 }
  0x42   : > { %827 = vmatprep.mubr.f32.mxu1 %v1662_v0 }
  0x43   : > { %1368 = vmatmul.mubr.msk.f32.gmra.mxu0 %vm443_vm2, %v435_v45 }
  0x44   : > { %610 = vmatprep.mubr.f32.mxu0 %v1662_v0 }
  0x45   : > { %1387 = vmatmul.mubr.msk.f32.gmra.mxu1 %vm655_vm1, %v420_v46 }
  0x46   : > { %833 = vmatprep.mubr.f32.mxu1 %v1662_v0 }
  0x47   : > { %1369 = vmatmul.mubr.msk.f32.gmra.mxu0 %vm443_vm2, %v436_v47 }
  0x48   : > { %616 = vmatprep.mubr.f32.mxu0 %v1662_v0 }
  0x49   : > { %1388 = vmatmul.mubr.msk.f32.gmra.mxu1 %vm655_vm1, %v421_v48 }
  0x4a   : > { %839 = vmatprep.mubr.f32.mxu1 %v1662_v0 }
  0x4b   : > { %1370 = vmatmul.mubr.msk.f32.gmra.mxu0 %vm443_vm2, %v437_v49 }
  0x4c   : > { %622 = vmatprep.mubr.f32.mxu0 %v1662_v0 }
  0x4d   : > { %1389 = vmatmul.mubr.msk.f32.gmra.mxu1 %vm655_vm1, %v422_v50 }
  0x4e   : > { %845 = vmatprep.mubr.f32.mxu1 %v1662_v0 }
  0x4f   : > { %1371 = vmatmul.mubr.msk.f32.gmra.mxu0 %vm443_vm2, %v438_v51 }
  0x50   : > { %628 = vmatprep.mubr.f32.mxu0 %v1662_v0 }
  0x51   : > { %1390 = vmatmul.mubr.msk.f32.gmra.mxu1 %vm655_vm1, %v423_v52 }
  0x52   : > { %851 = vmatprep.mubr.f32.mxu1 %v1662_v0 }
  0x53   : > { %1372 = vmatmul.mubr.msk.f32.gmra.mxu0 %vm443_vm2, %v439_v53 }
  0x54   : > { %634 = vmatprep.mubr.f32.mxu0 %v1662_v0 }
  0x55   : > { %1391 = vmatmul.mubr.msk.f32.gmra.mxu1 %vm655_vm1, %v424_v54 }
  0x56   : > { %857 = vmatprep.mubr.f32.mxu1 %v1662_v0 }
  0x57   : > { %1373 = vmatmul.mubr.msk.f32.gmra.mxu0 %vm443_vm2, %v440_v55 }
  0x58   : > { %640 = vmatprep.mubr.f32.mxu0 %v1662_v0 }
  0x59   : > { %1392 = vmatmul.mubr.msk.f32.gmra.mxu1 %vm655_vm1, %v425_v56 }
  0x5a   : > { %863 = vmatprep.mubr.f32.mxu1 %v1662_v0 }
  0x5b   : > { %1374 = vmatmul.mubr.msk.f32.gmra.mxu0 %vm443_vm2, %v441_v57 }
  0x5c   : > { %646 = vmatprep.mubr.f32.mxu0 %v1662_v0 }
  0x5d   : > { %1393 = vmatmul.mubr.msk.f32.gmra.mxu1 %vm655_vm1, %v426_v58 }
  0x5f   : > { %1375 = vmatmul.mubr.msk.f32.gmra.mxu0 %vm443_vm2, %v442_v59 }
  0x94   : > { %v889_v12 = vpop.permute.xlu0 %888  ;;  %v899_v18 = vpop.permute.xlu1 %898 }
  0x98   : > { %v894_v20 = vpop.permute.xlu0 %893 }
  0x99   : > { %v1989_v31 = vpop.permute.xlu1 %903 }
  0x9e   : > { %v909_v28 = vpop.permute.xlu0 %908 }
  0x9f   : > { %v914_v41 = vpop.permute.xlu1 %913 }
  0xa2   : > { %v919_v45 = vpop.permute.xlu0 %918 }
  0xa3   : > { %v924_v58 = vpop.permute.xlu1 %923 }
  0xe1   : > { %v775_v60 = vpop.f32.mrf.mxu1 }
  0xe3   : > { %v777_v61 = vpop.f32.mrf.mxu1  ;;  %v558_v62 = vpop.f32.mrf.mxu0 }
  0xe4   : > { %v776_v22 = vadd.f32 %v775_v60, %v558_v62 }
  0xe5   : > { %v781_v63 = vpop.f32.mrf.mxu1  ;;  %v560_v1 = vpop.f32.mrf.mxu0 }
  0xe6   : > { %v778_v24 = vadd.f32 %v777_v61, %v560_v1  ;;  %v966_v30 = vadd.f32 %v889_v12, %v776_v22 }
  0xe7   : > { %v783_v2 = vpop.f32.mrf.mxu1  ;;  %v564_v3 = vpop.f32.mrf.mxu0 }
  0xe8   : > { %v782_v27 = vadd.f32 %v781_v63, %v564_v3  ;;  %v967_v33 = vadd.f32 %v889_v12, %v778_v24  ;;  %v998_v39 = vmul.f32 0.5, %v966_v30  ;;  %v2003_v63 = vpop.permute.xlu0 %948 }
  0xe9   : > { %v787_v4 = vpop.f32.mrf.mxu1  ;;  %v566_v5 = vpop.f32.mrf.mxu0 }
  0xea   : > { %v968_v36 = vadd.f32 %v894_v20, %v782_v27  ;;  %v784_v37 = vadd.f32 %v783_v2, %v566_v5  ;;  %v999_v43 = vmul.f32 0.5, %v967_v33  ;;  %1474 = vtanh.f32 %v998_v39 }
  0xeb   : > { %v789_v6 = vpop.f32.mrf.mxu1  ;;  %v570_v7 = vpop.f32.mrf.mxu0 }
  0xec   : > { %v1000_v48 = vmul.f32 0.5, %v968_v36  ;;  %v969_v49 = vadd.f32 %v894_v20, %v784_v37  ;;  %1476 = vtanh.f32 %v999_v43  ;;  %v788_v54 = vadd.f32 %v787_v4, %v570_v7 }
  0xed   : > { %v793_v8 = vpop.f32.mrf.mxu1  ;;  %v572_v9 = vpop.f32.mrf.mxu0 }
  0xee   : > { %v790_v57 = vadd.f32 %v789_v6, %v572_v9  ;;  %1478 = vtanh.f32 %v1000_v48  ;;  %v1001_v60 = vmul.f32 0.5, %v969_v49  ;;  %v970_v4 = vadd.f32 %v899_v18, %v788_v54 }
  0xef   : > { %v1985_v0 = vpop.f32.mrf.mxu1  ;;  %v576_v10 = vpop.f32.mrf.mxu0 }
  0xf0   : > { %v794_v61 = vadd.f32 %v793_v8, %v576_v10  ;;  %v971_v6 = vadd.f32 %v899_v18, %v790_v57  ;;  %1480 = vtanh.f32 %v1001_v60 }
  0xf1   : > { %v799_v11 = vpop.f32.mrf.mxu1  ;;  %v1987_v13 = vpop.f32.mrf.mxu0 }
  0xf2   : > { %v796_v9 = vadd.f32 %v1985_v0, %v1987_v13  ;;  %v972_v8 = vadd.f32 %v1989_v31, %v794_v61  ;;  %v2022_v0 = vpop.permute.xlu0 %958 }
  0xf3   : > { %v801_v14 = vpop.f32.mrf.mxu1  ;;  %v582_v15 = vpop.f32.mrf.mxu0 }
  0xf4   : > { %v800_v40 = vadd.f32 %v799_v11, %v582_v15  ;;  %v973_v24 = vadd.f32 %v1989_v31, %v796_v9 }
  0xf5   : > { %v805_v16 = vpop.f32.mrf.mxu1  ;;  %v584_v17 = vpop.f32.mrf.mxu0 }
  0xf6   : > { %v802_v44 = vadd.f32 %v801_v14, %v584_v17  ;;  %v974_v52 = vadd.f32 %v909_v28, %v800_v40  ;;  %v1005_v31 = vmul.f32 0.5, %v973_v24 }
  0xf7   : > { %v807_v19 = vpop.f32.mrf.mxu1  ;;  %v588_v21 = vpop.f32.mrf.mxu0 }
  0xf8   : > { %v806_v50 = vadd.f32 %v805_v16, %v588_v21  ;;  %v975_v55 = vadd.f32 %v909_v28, %v802_v44  ;;  %v1030_v2 = vmul.f32 0.5, %v974_v52  ;;  %v1002_v21 = vmul.f32 0.5, %v970_v4  ;;  %v929_v44 = vpop.permute.xlu0 %928 }
  0xf9   : > { %v811_v23 = vpop.f32.mrf.mxu1  ;;  %v590_v25 = vpop.f32.mrf.mxu0 }
  0xfa   : > { %v976_v62 = vadd.f32 %v914_v41, %v806_v50  ;;  %v808_v3 = vadd.f32 %v807_v19, %v590_v25  ;;  %v1031_v7 = vmul.f32 0.5, %v975_v55  ;;  %1482 = vtanh.f32 %v1030_v2  ;;  %v2018_v19 = vpop.permute.xlu1 %953 }
  0xfb   : > { %v813_v26 = vpop.f32.mrf.mxu1  ;;  %v594_v29 = vpop.f32.mrf.mxu0 }
  0xfc   : > { %v812_v11 = vadd.f32 %v811_v23, %v594_v29  ;;  %v1032_v10 = vmul.f32 0.5, %v976_v62  ;;  %v977_v17 = vadd.f32 %v914_v41, %v808_v3  ;;  %1484 = vtanh.f32 %v1031_v7 }
  0xfd   : > { %v817_v32 = vpop.f32.mrf.mxu1  ;;  %v596_v34 = vpop.f32.mrf.mxu0  ;;  %v1003_v23 = vmul.f32 0.5, %v971_v6 }
  0xfe   : > { %v814_v15 = vadd.f32 %v813_v26, %v596_v34  ;;  %v978_v18 = vadd.f32 %v919_v45, %v812_v11  ;;  %v1004_v26 = vmul.f32 0.5, %v972_v8  ;;  %1486 = vtanh.f32 %v1032_v10  ;;  %v1475_v34 = vpop.eup %1474  ;;  %v2035_v40 = vpop.permute.xlu1 %963 }
  0xff   : > { %v1991_v35 = vpop.f32.mrf.mxu1  ;;  %v600_v38 = vpop.f32.mrf.mxu0  ;;  %v1033_v30 = vmul.f32 0.5, %v977_v17  ;;  %1488 = vtanh.f32 %v1002_v21  ;;  %v1014_v48 = vmul.f32 0.5, %v1475_v34 }
 0x100   : > { %v818_v22 = vadd.f32 %v817_v32, %v600_v38  ;;  %v979_v27 = vadd.f32 %v919_v45, %v814_v15  ;;  %v1034_v32 = vmul.f32 0.5, %v978_v18  ;;  %v1477_v38 = vpop.eup %1476  ;;  %1490 = vtanh.f32 %v1003_v23 }
 0x101   : > { %v1993_v42 = vpop.f32.mrf.mxu1  ;;  %v602_v46 = vpop.f32.mrf.mxu0  ;;  %1492 = vtanh.f32 %v1004_v26  ;;  %v1015_v52 = vmul.f32 0.5, %v1477_v38  ;;  %v2043_v9 = vadd.f32 0.5, %v1014_v48 }
 0x102   : > { %v820_v28 = vadd.f32 %v1991_v35, %v602_v46  ;;  %v980_v36 = vadd.f32 %v924_v58, %v818_v22  ;;  %v1035_v35 = vmul.f32 0.5, %v979_v27  ;;  %v1479_v46 = vpop.eup %1478  ;;  %1494 = vtanh.f32 %v1033_v30  ;;  %v934_v7 = vpop.permute.xlu1 %933 }
 0x103   : > { %v1995_v47 = vpop.f32.mrf.mxu1  ;;  %v606_v51 = vpop.f32.mrf.mxu0  ;;  %1496 = vtanh.f32 %v1034_v32  ;;  %v1016_v61 = vmul.f32 0.5, %v1479_v46  ;;  %v2045_v8 = vadd.f32 0.5, %v1015_v52 }
 0x104   : > { %v824_v39 = vadd.f32 %v1993_v42, %v606_v51  ;;  %v981_v43 = vadd.f32 %v924_v58, %v820_v28  ;;  %v1036_v54 = vmul.f32 0.5, %v980_v36  ;;  %1498 = vtanh.f32 %v1005_v31  ;;  %v1481_v4 = vpop.eup %1480  ;;  %v939_v31 = vpop.permute.xlu0 %938 }
 0x105   : > { %v1997_v53 = vpop.f32.mrf.mxu1  ;;  %v1999_v56 = vpop.f32.mrf.mxu0  ;;  %1500 = vtanh.f32 %v1035_v35  ;;  %v1017_v27 = vmul.f32 0.5, %v1481_v4  ;;  %v405_v4 = vld [vmem:[%s2065_s23 + $0x10] sm:$0xff] }
 0x106   : > { %v826_v55 = vadd.f32 %v1995_v47, %v1999_v56  ;;  %v982_v51 = vadd.f32 %v929_v44, %v824_v39  ;;  %v1037_v62 = vmul.f32 0.5, %v981_v43 }
 0x107   : > { %v2001_v59 = vpop.f32.mrf.mxu1  ;;  %v2005_v1 = vpop.f32.mrf.mxu0 }
 0x108   : > { %v830_v2 = vadd.f32 %v1997_v53, %v2005_v1  ;;  %v1483_v6 = vpop.eup %1482  ;;  %v983_v10 = vadd.f32 %v929_v44, %v826_v55  ;;  %v1062_v21 = vmul.f32 0.5, %v982_v51 }
 0x109   : > { %v2007_v5 = vpop.f32.mrf.mxu1  ;;  %v2009_v12 = vpop.f32.mrf.mxu0  ;;  %v1046_v28 = vmul.f32 0.5, %v1483_v6 }
 0x10a   : > { %v1485_v17 = vpop.eup %1484  ;;  %v832_v53 = vadd.f32 %v2001_v59, %v2009_v12  ;;  %v984_v22 = vadd.f32 %v934_v7, %v830_v2  ;;  %v1063_v34 = vmul.f32 0.5, %v983_v10 }
 0x10b   : > { %v2013_v14 = vpop.f32.mrf.mxu1  ;;  %v2016_v16 = vpop.f32.mrf.mxu0  ;;  %v1054_v52 = vadd.f32 0.5, %v1046_v28 }
 0x10c   : > { %v1487_v26 = vpop.eup %1486  ;;  %v836_v59 = vadd.f32 %v2007_v5, %v2016_v16  ;;  %v985_v38 = vadd.f32 %v934_v7, %v832_v53 }
 0x10d   : > { %v2020_v20 = vpop.f32.mrf.mxu1  ;;  %v2024_v13 = vpop.f32.mrf.mxu0  ;;  %v1048_v44 = vmul.f32 0.5, %v1487_v26 }
 0x10e   : > { %v1489_v36 = vpop.eup %1488  ;;  %v838_v46 = vadd.f32 %v2013_v14, %v2024_v13  ;;  %v986_v14 = vadd.f32 %v939_v31, %v836_v59  ;;  %v1065_v51 = vmul.f32 0.5, %v985_v38 }
 0x10f   : > { %v2027_v25 = vpop.f32.mrf.mxu1  ;;  %v2030_v29 = vpop.f32.mrf.mxu0  ;;  %v1018_v2 = vmul.f32 0.5, %v1489_v36 }
 0x110   : > { %v1491_v43 = vpop.eup %1490  ;;  %v842_v13 = vadd.f32 %v2020_v20, %v2030_v29  ;;  %v1066_v10 = vmul.f32 0.5, %v986_v14 }
 0x111   : > { %v847_v33 = vpop.f32.mrf.mxu1  ;;  %v2032_v37 = vpop.f32.mrf.mxu0  ;;  %v1019_v53 = vmul.f32 0.5, %v1491_v43  ;;  %v1026_v38 = vadd.f32 0.5, %v1018_v2  ;;  %v410_v2 = vld [vmem:[%s2065_s23 + $0x38] sm:$0xff] }
 0x112   : > { %v2058_v16 = vpop.eup %1492 }
 0x113   : > { %v849_v41 = vpop.f32.mrf.mxu1  ;;  %v630_v45 = vpop.f32.mrf.mxu0 }
 0x114   : > { %v848_v49 = vadd.f32 %v847_v33, %v630_v45  ;;  %v1047_v33 = vmul.f32 0.5, %v1485_v17  ;;  %v1064_v45 = vmul.f32 0.5, %v984_v22 }
 0x115   : > { %v853_v50 = vpop.f32.mrf.mxu1  ;;  %v632_v42 = vpop.f32.mrf.mxu0 }
 0x116   : > { %v990_v57 = vadd.f32 %v2003_v63, %v848_v49  ;;  %v850_v60 = vadd.f32 %v849_v41, %v632_v42  ;;  %v1055_v42 = vadd.f32 0.5, %v1047_v33 }
 0x117   : > { %v855_v58 = vpop.f32.mrf.mxu1  ;;  %v636_v3 = vpop.f32.mrf.mxu0 }
 0x118   : > { %1502 = vtanh.f32 %v990_v57  ;;  %v991_v11 = vadd.f32 %v2003_v63, %v850_v60  ;;  %v854_v47 = vadd.f32 %v853_v50, %v636_v3  ;;  %v2050_v63 = vadd.f32 0.5, %v1016_v61  ;;  %v1495_v50 = vpop.eup %1494  ;;  %v404_v3 = vld [vmem:[%s2065_s23 + $0x8] sm:$0xff] }
 0x119   : > { %v859_v56 = vpop.f32.mrf.mxu1  ;;  %1504 = vtanh.f32 %v1036_v54  ;;  %v638_v15 = vpop.f32.mrf.mxu0  ;;  %v1056_v61 = vadd.f32 0.5, %v1048_v44  ;;  %v1049_v7 = vmul.f32 0.5, %v1495_v50 }
 0x11a   : > { %1506 = vtanh.f32 %v991_v11  ;;  %v992_v1 = vadd.f32 %v2018_v19, %v854_v47  ;;  %v856_v23 = vadd.f32 %v855_v58, %v638_v15  ;;  %v1497_v55 = vpop.eup %1496  ;;  %v403_v58 = vld [vmem:[%s2065_s23] sm:$0xff]  ;;  %v944_v11 = vpop.permute.xlu1 %943  ;;  %v844_v47 = vadd.f32 %v2027_v25, %v2032_v37 }
 0x11b   : > { %v861_v18 = vpop.f32.mrf.mxu1  ;;  %1508 = vtanh.f32 %v1037_v62  ;;  %v642_v24 = vpop.f32.mrf.mxu0  ;;  %v987_v62 = vadd.f32 %v939_v31, %v838_v46  ;;  %v1050_v6 = vmul.f32 0.5, %v1497_v55  ;;  %v988_v15 = vadd.f32 %v944_v11, %v842_v13 }
 0x11c   : > { %1510 = vtanh.f32 %v992_v1  ;;  %v860_v30 = vadd.f32 %v859_v56, %v642_v24  ;;  %v993_v12 = vadd.f32 %v2018_v19, %v856_v23  ;;  %v2067_v19 = vadd.f32 0.5, %v1017_v27  ;;  %v2076_v60 = vpop.eup %1498 }
 0x11d   : > { %v644_v32 = vpop.f32.mrf.mxu0  ;;  %1512 = vtanh.f32 %v1062_v21  ;;  %v865_v35 = vpop.f32.mrf.mxu1  ;;  %v1102_v1 = vmul.f32 %v1054_v52, %v403_v58  ;;  %v1103_v23 = vmul.f32 %v1055_v42, %v404_v3  ;;  %v1104_v24 = vmul.f32 %v1056_v61, %v405_v4  ;;  %v409_v42 = vld [vmem:[%s2065_s23 + $0x30] sm:$0xff] }
 0x11e   : > { %v994_v39 = vadd.f32 %v2022_v0, %v860_v30  ;;  %v862_v41 = vadd.f32 %v861_v18, %v644_v32  ;;  %1514 = vtanh.f32 %v993_v12  ;;  %v1501_v29 = vpop.eup %1500  ;;  %v1067_v25 = vmul.f32 0.5, %v987_v62 }
 0x11f   : > { %v648_v5 = vpop.f32.mrf.mxu0  ;;  %v867_v57 = vpop.f32.mrf.mxu1  ;;  %v1051_v26 = vmul.f32 0.5, %v1501_v29  ;;  %v989_v27 = vadd.f32 %v944_v11, %v844_v47  ;;  %v1057_v33 = vadd.f32 0.5, %v1049_v7  ;;  %v1068_v59 = vmul.f32 0.5, %v988_v15 }
 0x120   : > { %1516 = vtanh.f32 %v994_v39  ;;  %v995_v48 = vadd.f32 %v2022_v0, %v862_v41  ;;  %v866_v49 = vadd.f32 %v865_v35, %v648_v5  ;;  %v1027_v31 = vadd.f32 0.5, %v1019_v53  ;;  %v407_v41 = vld [vmem:[%s2065_s23 + $0x20] sm:$0xff] }
 0x121   : > { %1518 = vtanh.f32 %v1063_v34  ;;  %v650_v54 = vpop.f32.mrf.mxu0  ;;  %v1058_v34 = vadd.f32 0.5, %v1050_v6  ;;  %v1020_v39 = vmul.f32 0.5, %v2058_v16  ;;  %v1059_v43 = vadd.f32 0.5, %v1051_v26 }
 0x122   : > { %1520 = vtanh.f32 %v995_v48  ;;  %v996_v0 = vadd.f32 %v2035_v40, %v866_v49  ;;  %v868_v20 = vadd.f32 %v867_v57, %v650_v54  ;;  %v1069_v44 = vmul.f32 0.5, %v989_v27  ;;  %v408_v48 = vld [vmem:[%s2065_s23 + $0x28] sm:$0xff] }
 0x123   : > { %1522 = vtanh.f32 %v1064_v45  ;;  %v1106_v52 = vmul.f32 %v1058_v34, %v407_v41  ;;  %v1028_v54 = vadd.f32 0.5, %v1020_v39  ;;  %v1021_v55 = vmul.f32 0.5, %v2076_v60 }
 0x124   : > { %1524 = vtanh.f32 %v996_v0  ;;  %v997_v17 = vadd.f32 %v2035_v40, %v868_v20  ;;  %v1107_v57 = vmul.f32 %v1059_v43, %v408_v48 }
 0x125   : > { %v1503_v56 = vpop.eup %1502  ;;  %1526 = vtanh.f32 %v1065_v51  ;;  %v1029_v7 = vadd.f32 0.5, %v1021_v55 }
 0x126   : > { %v1505_v21 = vpop.eup %1504  ;;  %v1110_v18 = vmul.f32 %v1503_v56, %v2043_v9  ;;  %1528 = vtanh.f32 %v997_v17  ;;  %v406_v9 = vld [vmem:[%s2065_s23 + $0x18] sm:$0xff]  ;;  %s1558_s23 = sshll.u32 %s1664_s22, 4  ;;  %s1559_s23 = int_to_ptr.vmem [resolvable:$false] %s1558_s23 }
 0x127   : > { %v1507_v22 = vpop.eup %1506  ;;  %1530 = vtanh.f32 %v1066_v10  ;;  %v1052_v12 = vmul.f32 0.5, %v1505_v21  ;;  %v1105_v5 = vmul.f32 %v1057_v33, %v406_v9  ;;  %p1561_p1 = scmp.lt.s32.totalorder %s2116_s10, %s1559_s23 }
 0x128   : > { %v1509_v37 = vpop.eup %1508  ;;  %v1118_v28 = vadd.f32 %v1110_v18, %v1102_v1  ;;  %v1111_v30 = vmul.f32 %v1507_v22, %v2045_v8 }
 0x129   : > { %v1511_v40 = vpop.eup %1510  ;;  %v1053_v49 = vmul.f32 0.5, %v1509_v37  ;;  %v1060_v16 = vadd.f32 0.5, %v1052_v12 }
 0x12a   : > { %1532 = vtanh.f32 %v1118_v28  ;;  %1150 = vst [vmem:[%s2090_s30] sm:$0xff] %v1118_v28  ;;  %v1119_v32 = vadd.f32 %v1111_v30, %v1103_v23  ;;  %v1112_v36 = vmul.f32 %v1511_v40, %v2050_v63  ;;  %v1513_v8 = vpop.eup %1512 }
 0x12b   : > { %1534 = vtanh.f32 %v1067_v25  ;;  %v1515_v35 = vpop.eup %1514  ;;  %v1061_v62 = vadd.f32 0.5, %v1053_v49  ;;  %v1078_v20 = vmul.f32 0.5, %v1513_v8  ;;  %v1108_v29 = vmul.f32 %v1060_v16, %v409_v42 }
 0x12c   : > { %1536 = vtanh.f32 %v1119_v32  ;;  %1151 = vst [vmem:[%s2090_s30 + $0x8] sm:$0xff] %v1119_v32  ;;  %v1120_v45 = vadd.f32 %v1112_v36, %v1104_v24  ;;  %v1113_v63 = vmul.f32 %v1515_v35, %v2067_v19 }
 0x12d   : > { %v1517_v46 = vpop.eup %1516  ;;  %1538 = vtanh.f32 %v1068_v59  ;;  %v1109_v6 = vmul.f32 %v1061_v62, %v410_v2  ;;  %v1086_v17 = vadd.f32 0.5, %v1078_v20 }
 0x12e   : > { %v1519_v50 = vpop.eup %1518  ;;  %1540 = vtanh.f32 %v1120_v45  ;;  %1152 = vst [vmem:[%s2090_s30 + $0x10] sm:$0xff] %v1120_v45  ;;  %v1114_v14 = vmul.f32 %v1517_v46, %v1026_v38  ;;  %v1121_v51 = vadd.f32 %v1113_v63, %v1105_v5 }
 0x12f   : > { %v1521_v13 = vpop.eup %1520  ;;  %1542 = vtanh.f32 %v1069_v44  ;;  %v1079_v47 = vmul.f32 0.5, %v1519_v50 }
 0x130   : > { %v1523_v0 = vpop.eup %1522  ;;  %v1122_v58 = vadd.f32 %v1114_v14, %v1106_v52  ;;  %v1115_v19 = vmul.f32 %v1521_v13, %v1027_v31  ;;  %1544 = vtanh.f32 %v1121_v51  ;;  %1153 = vst [vmem:[%s2090_s30 + $0x18] sm:$0xff] %v1121_v51 }
 0x131   : > { %v1525_v61 = vpop.eup %1524  ;;  %v1080_v21 = vmul.f32 0.5, %v1523_v0  ;;  %v1087_v22 = vadd.f32 0.5, %v1079_v47 }
 0x132   : > { %1546 = vtanh.f32 %v1122_v58  ;;  %1154 = vst [vmem:[%s2090_s30 + $0x20] sm:$0xff] %v1122_v58  ;;  %v1123_v60 = vadd.f32 %v1115_v19, %v1107_v57  ;;  %v1116_v3 = vmul.f32 %v1525_v61, %v1028_v54  ;;  %v1527_v4 = vpop.eup %1526 }
 0x133   : > { %v1529_v11 = vpop.eup %1528  ;;  %v1081_v25 = vmul.f32 0.5, %v1527_v4  ;;  %v1088_v26 = vadd.f32 0.5, %v1080_v21 }
 0x134   : > { %1548 = vtanh.f32 %v1123_v60  ;;  %1155 = vst [vmem:[%s2090_s30 + $0x28] sm:$0xff] %v1123_v60  ;;  %v1124_v56 = vadd.f32 %v1116_v3, %v1108_v29  ;;  %v1117_v10 = vmul.f32 %v1529_v11, %v1029_v7  ;;  %v1531_v15 = vpop.eup %1530 }
 0x135   : > { %v1082_v27 = vmul.f32 0.5, %v1531_v15 }
 0x136   : > { %1550 = vtanh.f32 %v1124_v56  ;;  %1156 = vst [vmem:[%s2090_s30 + $0x30] sm:$0xff] %v1124_v56  ;;  %v1125_v1 = vadd.f32 %v1117_v10, %v1109_v6 }
 0x137   : > { %v1533_v53 = vpop.eup %1532 }
 0x138   : > { %v1535_v18 = vpop.eup %1534  ;;  %v1134_v23 = vmul.f32 %v1533_v53, %v1086_v17  ;;  %1552 = vtanh.f32 %v1125_v1  ;;  %1157 = vst [vmem:[%s2090_s30 + $0x38] sm:$0xff] %v1125_v1  ;;  %s1560_s30 = scalar_lea.vmem %s1559_s23, 2048 }
 0x139   : > { %v1537_v24 = vpop.eup %1536  ;;  %p1562_p2 = scmp.lt.s32.totalorder %s1560_s30, %s1554_s20 }
 0x13a   : > { %v1539_v37 = vpop.eup %1538  ;;  %1142 = vst [vmem:[%s2121_s19] sm:$0xff] %v1134_v23  ;;  %v1135_v28 = vmul.f32 %v1537_v24, %v1087_v22 }
 0x13b   : > { %p1563_p3 = por %p1562_p2, %p1561_p1 }
 0x13d   : > { %p1564_p5 = pnand %p1563_p3, %p1557_p0 }
 0x13f   : > { %1567 = shalt.err (!%p1564_p5)
}
 0x140   : > { %s1568_s16 = scalar_lea.hbm %s2114_s18, 1024  ;;  %s1572_s22 = scalar_lea.hbm %s2220_s7, 2048 }
 0x141   : > { %p1569_p6 = scmp.ne.s32.totalorder %s2114_s18, %s1568_s16  ;;  %p1573_p10 = scmp.lt.s32.totalorder %s2114_s18, %s2220_s7 }
 0x142   : > { %p1574_p11 = scmp.lt.s32.totalorder %s1572_s22, %s1568_s16 }
 0x143   : > { %p1570_p7 = pnand %p1569_p6, %p1748_p4 }
 0x144   : > { %p1575_p12 = por %p1574_p11, %p1573_p10 }
 0x145   : > { %p1571_p9 = pneg %p1570_p7 }
 0x147   : > { %p1576_p13 = pnand %p1575_p12, %p1571_p9 }
 0x149   : > { %1579 = shalt.err (!%p1576_p13)
}
 0x14a   : > { %s1665_s20 = smov 256   ;;  %s1666_s23 = smov 16   ;;  %v1541_v30 = vpop.eup %1540  ;;  %v1083_v40 = vmul.f32 0.5, %v1535_v18  ;;  %1143 = vst [vmem:[%s2121_s19 + $0x8] sm:$0xff] %v1135_v28  ;;  %v1089_v59 = vadd.f32 0.5, %v1081_v25  ;;  %v1090_v12 = vadd.f32 0.5, %v1082_v27 }
 0x14b   : > { %s2224_s30 = scalar_lea.sflag [#allocation5], %s2073_s15  ;;  %v1136_v33 = vmul.f32 %v1541_v30, %v1088_v26  ;;  %v1543_v34 = vpop.eup %1542  ;;  %v1084_v32 = vmul.f32 0.5, %v1539_v37  ;;  %s1179_s8 = sshll.u32 %s2121_s19, 4  ;;  %s2164_s8 = int_to_ptr.vmem [resolvable:$true] %s1179_s8 }
 0x14c   : > { %1408 = dma.vmem_to_hbm [thread:$0]  (%p1748_p4), %s2116_s10, 1024, %s2114_s18, %s2224_s30, %s1665_s20, %s1665_s20, %s1666_s23   ;;  %v1545_v9 = vpop.eup %1544  ;;  %v1091_v38 = vadd.f32 0.5, %v1083_v40  ;;  %v1085_v41 = vmul.f32 0.5, %v1543_v34 }
 0x14d   : > { %1144 = vst [vmem:[%s2121_s19 + $0x10] sm:$0xff] %v1136_v33  ;;  %v1547_v36 = vpop.eup %1546  ;;  %v1137_v8 = vmul.f32 %v1545_v9, %v1089_v59  ;;  %v1092_v35 = vadd.f32 0.5, %v1084_v32  ;;  %s2225_s10 = sshll.u32 %s1652_s27, 10  ;;  %s1159_s12 = scalar_lea.sflag [#allocation3], %s2073_s15 }
 0x14e   : > { %v1138_v31 = vmul.f32 %v1547_v36, %v1090_v12  ;;  %v1549_v39 = vpop.eup %1548  ;;  %v1093_v46 = vadd.f32 0.5, %v1085_v41  ;;  %s2162_s16 = scalar_lea.hbm %s2219_s6, %s2225_s10  ;;  %s1580_s17 = scalar_lea.vmem %s2164_s8, 1024 }
 0x14f   : > { %1145 = vst [vmem:[%s2121_s19 + $0x18] sm:$0xff] %v1137_v8  ;;  %v1139_v43 = vmul.f32 %v1549_v39, %v1091_v38  ;;  %v1551_v44 = vpop.eup %1550  ;;  %p1581_p0 = scmp.ne.s32.totalorder %s2164_s8, %s1580_s17  ;;  %s1667_s22 = smov [#allocation2]  }
 0x150   : > { %1146 = vst [vmem:[%s2121_s19 + $0x20] sm:$0xff] %v1138_v31  ;;  %v1140_v45 = vmul.f32 %v1551_v44, %v1092_v35  ;;  %v1553_v5 = vpop.eup %1552  ;;  %s1584_s30 = sshll.u32 %s1667_s22, 4  ;;  %s1585_s30 = int_to_ptr.vmem [resolvable:$false] %s1584_s30 }
 0x151   : > { %1147 = vst [vmem:[%s2121_s19 + $0x28] sm:$0xff] %v1139_v43  ;;  %v1141_v48 = vmul.f32 %v1553_v5, %v1093_v46  ;;  %p1582_p1 = pnand %p1581_p0, %p1748_p4  ;;  %s1586_s27 = scalar_lea.vmem %s1585_s30, 2048 }
 0x152   : > { %1148 = vst [vmem:[%s2121_s19 + $0x30] sm:$0xff] %v1140_v45  ;;  %p1587_p3 = scmp.lt.s32.totalorder %s2164_s8, %s1585_s30  ;;  %p1588_p5 = scmp.lt.s32.totalorder %s1586_s27, %s1580_s17 }
 0x153   : > { %1149 = vst [vmem:[%s2121_s19 + $0x38] sm:$0xff] %v1141_v48  ;;  %p1583_p2 = pneg %p1582_p1 }
 0x154   : > { %p1589_p6 = por %p1588_p5, %p1587_p3 }
 0x156   : > { %p1590_p7 = pnand %p1589_p6, %p1583_p2 }
 0x158   : > { %1593 = shalt.err (!%p1590_p7)
}
 0x159   : > { %s1594_s19 = scalar_lea.hbm %s2162_s16, 1024  ;;  %s1598_s18 = scalar_lea.hbm %s2219_s6, 2048 }
 0x15a   : > { %p1595_p9 = scmp.ne.s32.totalorder %s2162_s16, %s1594_s19  ;;  %p1599_p12 = scmp.lt.s32.totalorder %s2162_s16, %s2219_s6 }
 0x15b   : > { %p1600_p13 = scmp.lt.s32.totalorder %s1598_s18, %s1594_s19 }
 0x15c   : > { %p1596_p10 = pnand %p1595_p9, %p1748_p4 }
 0x15d   : > { %p1601_p0 = por %p1600_p13, %p1599_p12 }
 0x15e   : > { %p1597_p11 = pneg %p1596_p10 }
 0x160   : > { %p1602_p1 = pnand %p1601_p0, %p1597_p11 }
 0x162   : > { %1605 = shalt.err (!%p1602_p1)
}
 0x163   : > { %1407 = dma.vmem_to_hbm [thread:$0]  (%p1748_p4), %s2164_s8, 1024, %s2162_s16, %s1159_s12, %s1665_s20, %s1665_s20, %s1666_s23  }
 0x164 PF: > { %p1418_p2 = scmp.ge.s32.totalorder %s1660_s29, 2  ;;  %s1212_s17 = sand.u32 1, %s1640_s24  }
 0x165   : > { %s1213_s30 = scalar_lea.sflag [#allocation3], %s1212_s17 }
 0x166   : > { %p1412_p3 = pnand %p1418_p2, %p1755_p8 }
 0x168   : > { %p1413_p5 = pneg %p1412_p3 }
 0x16a   : > { %1631 = dma.done.wait (%p1413_p5), %s1213_s30, 1024  }
 0x16b   : > { %1633 = vsyncadd (%p1413_p5), %s1213_s30, 4294966272  ;;  %s1222_s27 = scalar_lea.sflag [#allocation5], %s1212_s17 }
 0x16c   : > { %1635 = dma.done.wait (%p1413_p5), %s1222_s27, 1024  }
 0x16d   : > { %1637 = vsyncadd (%p1413_p5), %s1222_s27, 4294966272  ;;  %s24_s29 = sadd.s32 1, %s1660_s29   ;;  %s2226_s24 = smov %s1644_s25 }
 0x16e   : > { %p21_p6 = scmp.ge.s32.totalorder %s24_s29, 4   ;;  %s2227_s25 = smov %s1648_s26 }
 0x16f   : > { %s2228_s26 = smov %s1761_s14  ;;  %s2229_s27 = smov %s1656_s28 }
 0x170   : > { %s2230_s28 = smov %s2232_s9  ;;  %23 = sbr.rel (!%p21_p6) target bundleno = 6 (0x6), region = 102 }
 0x175   :  { %1227 = vsyncpa [#allocation3], 1 }
 0x176   :  { %1229 = vsyncpa [#allocation3 + $0x1], 1 }
 0x177   :  { %1230 = vsyncpa [#allocation5], 1 }
 0x178   :  { %1232 = vsyncpa [#allocation5 + $0x1], 1 }

</bundles_post_ra>
